<compile_context>
chip_gen: v5e
topology: v5e:2x2
jax: 0.10.0
libtpu: 0.0.40
codegen_flags: <defaults>
</compile_context>

<pallas_src>
import jax
import jax.numpy as jnp
from jax.experimental import pallas as pl
from jax.experimental.pallas import tpu as pltpu


def _round_up(n, m):
    return ((n + m - 1) // m) * m


def _cdiv(a, b):
    return (a + b - 1) // b


def _vmem_capacity_bytes():
    """Physical VMEM per core; conservative 64 MiB (v7x) fallback."""
    try:
        info = pltpu.get_tpu_info()
        cap = getattr(info, "vmem_capacity_bytes", None)
        if cap:
            return int(cap)
    except Exception:
        pass
    return 64 * 1024 * 1024


# ----------------------------------------------------------------------------
# Kernels
# ----------------------------------------------------------------------------

def _folded_kernel(x_ref, w_ref, o_ref):
    # x: (tile_b, ch_in); w: (ch_in, ch_out_p); o: (tile_b, ch_out_p)
    o_ref[...] = jnp.dot(
        x_ref[...], w_ref[...], preferred_element_type=jnp.float32
    ).astype(o_ref.dtype)


def _lowrank_kernel(x_ref, w1_ref, w2_ref, o_ref, h_ref):
    # x: (tile_b, ch_in); w1: (ch_in, rank_p); w2: (rank_p, tile_n)
    # o: (tile_b, tile_n); h scratch: (tile_b, rank_p)
    # h depends only on the batch tile -> compute once per batch tile (j == 0).
    @pl.when(pl.program_id(1) == 0)
    def _():
        h_ref[...] = jnp.dot(
            x_ref[...], w1_ref[...], preferred_element_type=jnp.float32
        ).astype(h_ref.dtype)

    o_ref[...] = jnp.dot(
        h_ref[...], w2_ref[...], preferred_element_type=jnp.float32
    ).astype(o_ref.dtype)


# ----------------------------------------------------------------------------
# Tiling helpers
# ----------------------------------------------------------------------------

def _pick_tile_b(B, resident_bytes, row_bytes, budget, prefer, sublane):
    avail = budget - resident_bytes
    max_rows = sublane if avail <= 0 else max(sublane, avail // max(row_bytes, 1))
    tile = min(prefer, max_rows)
    # v7x megacore: keep both TensorCores busy — at least 2 batch tiles when
    # the batch is large enough (no effect on single-TC v5e/v6e).
    if B >= 256:
        tile = min(tile, _round_up(_cdiv(B, 2), 128))
    if tile >= B:
        return B                      # full-extent block is always layout-legal
    if tile >= 128:
        return (tile // 128) * 128    # MXU-friendly M, unmasked sublanes
    return max(sublane, (tile // sublane) * sublane)


def _weight_spec(block_shape, index_map, single_buffer):
    if single_buffer:
        # Constant index_map -> the second pipeline buffer is pure waste.
        return pl.BlockSpec(block_shape, index_map, pipeline_mode=pl.Buffered(1))
    return pl.BlockSpec(block_shape, index_map)


# ----------------------------------------------------------------------------
# Public API
# ----------------------------------------------------------------------------

def make_fast_params_linear(w_in, w_mid, w_out, *, compute_dtype=None,
                            prefer_tile_b=1024):
    """Fold / pad the FastParamsLinear weights ONCE and return apply(x).

    w_in:  (ch_middle, ch_in)   -- nn.Linear(ch_in, ch_middle).weight
    w_mid: (ch_middle,)
    w_out: (ch_out, ch_middle)  -- nn.Linear(ch_middle, ch_out).weight

    compute_dtype: optional (e.g. jnp.bfloat16) dtype for x / weights on the
    MXU.  Accumulation is always f32; the output keeps x.dtype.  Opt-in since
    it changes rounding of inputs/weights.
    """
    ch_middle, ch_in = w_in.shape
    ch_out = w_out.shape[0]
    assert w_mid.shape == (ch_middle,)
    assert w_out.shape == (ch_out, ch_middle)

    w_dtype = compute_dtype if compute_dtype is not None else w_in.dtype
    w_it = jnp.dtype(w_dtype).itemsize

    cap = _vmem_capacity_bytes()
    budget = int(cap * 0.6)           # tile-sizing budget (headroom for compiler)

    ch_out_p = _round_up(ch_out, 128)   # lane-dense output stores
    rank_p = _round_up(ch_middle, 128)  # lane/contraction padding, low-rank path

    # Regime gate: per-row MXU work (== per-row weight bytes) of each form.
    folded_cost = ch_in * ch_out_p
    lowrank_cost = rank_p * (ch_in + ch_out_p)
    use_folded = (folded_cost <= lowrank_cost
                  and ch_in * ch_out_p * w_it <= budget // 4)

    # ---- one-time weight preparation (hoisted out of the per-call path) ----
    if use_folded:
        w_fused_t = jnp.einsum(
            "mi,m,om->io",
            w_in.astype(jnp.float32), w_mid.astype(jnp.float32),
            w_out.astype(jnp.float32))                     # (ch_in, ch_out), f32 fold
        if ch_out_p != ch_out:
            w_fused_t = jnp.pad(w_fused_t, ((0, 0), (0, ch_out_p - ch_out)))
        weights = (w_fused_t.astype(w_dtype),)
    else:
        w1 = jnp.pad(w_in.astype(jnp.float32).T,
                     ((0, 0), (0, rank_p - ch_middle)))    # (ch_in, rank_p)
        w2 = (w_out.astype(jnp.float32) * w_mid.astype(jnp.float32)).T
        w2 = jnp.pad(w2, ((0, rank_p - ch_middle),
                          (0, ch_out_p - ch_out)))         # (rank_p, ch_out_p)
        weights = (w1.astype(w_dtype), w2.astype(w_dtype))

    # ------------------------------------------------------------------ folded
    def _apply_folded(x2d, single_buffer):
        B = x2d.shape[0]
        out_dtype = x2d.dtype
        x_c = x2d.astype(w_dtype) if compute_dtype is not None else x2d
        x_it = jnp.dtype(x_c.dtype).itemsize
        out_it = jnp.dtype(out_dtype).itemsize
        (w,) = weights

        resident = ch_in * ch_out_p * w_it * (1 if single_buffer else 2)
        row_bytes = 2 * ch_in * x_it + 2 * ch_out_p * out_it   # double-buffered x/out
        tile_b = _pick_tile_b(B, resident, row_bytes, budget, prefer_tile_b,
                              sublane=16 if x_it == 2 else 8)
        grid = (_cdiv(B, tile_b),)

        # Worst-case footprint (double-buffered weight) drives the scoped limit.
        footprint = 2 * ch_in * ch_out_p * w_it + tile_b * row_bytes
        vmem_limit = int(min(cap * 0.9, max(footprint + (4 << 20), 32 << 20)))

        out_p = pl.pallas_call(
            _folded_kernel,
            out_shape=jax.ShapeDtypeStruct((B, ch_out_p), out_dtype),
            grid=grid,
            in_specs=[
                pl.BlockSpec((tile_b, ch_in), lambda i: (i, 0)),
                _weight_spec((ch_in, ch_out_p), lambda i: (0, 0), single_buffer),
            ],
            out_specs=pl.BlockSpec((tile_b, ch_out_p), lambda i: (i, 0)),
            compiler_params=pltpu.CompilerParams(
                dimension_semantics=("parallel",),
                vmem_limit_bytes=vmem_limit,
            ),
            cost_estimate=pl.CostEstimate(
                flops=2 * B * ch_in * ch_out_p,
                bytes_accessed=(B * ch_in * x_it + ch_in * ch_out_p * w_it
                                + B * ch_out_p * out_it),
                transcendentals=0,
            ),
        )(x_c, w)
        return out_p[:, :ch_out] if ch_out_p != ch_out else out_p

    # ---------------------------------------------------------------- low-rank
    def _apply_lowrank(x2d, single_buffer):
        B = x2d.shape[0]
        out_dtype = x2d.dtype
        x_c = x2d.astype(w_dtype) if compute_dtype is not None else x2d
        x_it = jnp.dtype(x_c.dtype).itemsize
        out_it = jnp.dtype(out_dtype).itemsize
        h_it = x_it
        w1, w2 = weights

        w1_bytes = ch_in * rank_p * w_it * (1 if single_buffer else 2)

        # Output (N) tile: full width if it fits, else largest multiple of 128
        # that still leaves room for >=128 batch rows of pipelined x/out tiles.
        tile_n = ch_out_p
        while True:
            n_tiles = _cdiv(ch_out_p, tile_n)
            w2_bufs = 1 if (n_tiles == 1 and single_buffer) else 2
            resident = w1_bytes + w2_bufs * rank_p * tile_n * w_it
            row_bytes = 2 * ch_in * x_it + 2 * tile_n * out_it + rank_p * h_it
            if tile_n == 128 or resident + min(B, 128) * row_bytes <= budget:
                break
            tile_n = max(128, _round_up(tile_n // 2, 128))

        tile_b = _pick_tile_b(B, resident, row_bytes, budget, prefer_tile_b,
                              sublane=16 if x_it == 2 else 8)
        grid = (_cdiv(B, tile_b), n_tiles)

        footprint = (2 * ch_in * rank_p * w_it + 2 * rank_p * tile_n * w_it
                     + tile_b * row_bytes)
        vmem_limit = int(min(cap * 0.9, max(footprint + (4 << 20), 32 << 20)))

        out_p = pl.pallas_call(
            _lowrank_kernel,
            out_shape=jax.ShapeDtypeStruct((B, ch_out_p), out_dtype),
            grid=grid,
            in_specs=[
                # x block is invariant in j -> not re-DMA'd across N tiles.
                pl.BlockSpec((tile_b, ch_in), lambda i, j: (i, 0)),
                _weight_spec((ch_in, rank_p), lambda i, j: (0, 0), single_buffer),
                _weight_spec((rank_p, tile_n), lambda i, j: (0, j),
                             single_buffer and n_tiles == 1),
            ],
            out_specs=pl.BlockSpec((tile_b, tile_n), lambda i, j: (i, j)),
            scratch_shapes=[pltpu.VMEM((tile_b, rank_p), x_c.dtype)],
            compiler_params=pltpu.CompilerParams(
                # j is NOT parallel: the h scratch is initialized at j == 0.
                dimension_semantics=("parallel", "arbitrary"),
                vmem_limit_bytes=vmem_limit,
            ),
            cost_estimate=pl.CostEstimate(
                flops=2 * B * rank_p * (ch_in + ch_out_p),
                bytes_accessed=(B * ch_in * x_it
                                + (ch_in * rank_p + rank_p * ch_out_p) * w_it
                                + B * ch_out_p * out_it),
                transcendentals=0,
            ),
        )(x_c, w1, w2)
        return out_p[:, :ch_out] if ch_out_p != ch_out else out_p

    def _apply_impl(x2d, single_buffer):
        if use_folded:
            return _apply_folded(x2d, single_buffer)
        return _apply_lowrank(x2d, single_buffer)

    def apply(x):
        lead = x.shape[:-1]
        assert x.shape[-1] == ch_in
        x2d = x.reshape(-1, ch_in)
        try:
            y = _apply_impl(x2d, single_buffer=True)
        except Exception:
            # Fallback if this jax version rejects pl.Buffered(1) (single-
            # buffered resident weights): rebuild with default double buffering.
            y = _apply_impl(x2d, single_buffer=False)
        return y.reshape(*lead, ch_out)

    return apply


def fast_params_linear(x, w_in, w_mid, w_out, *, compute_dtype=None,
                       prefer_tile_b=1024):
    """One-shot convenience wrapper (prefer make_fast_params_linear + reuse)."""
    return make_fast_params_linear(
        w_in, w_mid, w_out, compute_dtype=compute_dtype,
        prefer_tile_b=prefer_tile_b)(x)


if __name__ == "__main__":
    key = jax.random.PRNGKey(0)

    # ---- Test 1: module's demo shapes (folded single-matmul path) ----------
    ch_in, ch_middle, ch_out = 32, 8, 32
    batch = 8
    kx, kin, kmid, kout = jax.random.split(key, 4)
    x = jax.random.normal(kx, (batch, ch_in), dtype=jnp.float32)
    w_in = jax.random.normal(kin, (ch_middle, ch_in), dtype=jnp.float32) * 0.1
    w_mid = jax.random.normal(kmid, (ch_middle,), dtype=jnp.float32)
    w_out = jax.random.normal(kout, (ch_out, ch_middle), dtype=jnp.float32) * 0.1

    apply_fn = make_fast_params_linear(w_in, w_mid, w_out)  # weights folded once
    y = jax.block_until_ready(apply_fn(x))
    y_ref = ((x @ w_in.T) * w_mid) @ w_out.T
    assert y.shape == (batch, ch_out)
    assert jnp.allclose(y, y_ref, atol=1e-4, rtol=1e-4), "folded path mismatch"

    # ---- Test 2: wider channels exercising the low-rank (unfused) path -----
    ch_in2, ch_middle2, ch_out2 = 512, 8, 512
    batch2 = 256
    k2 = jax.random.split(jax.random.PRNGKey(1), 4)
    x2 = jax.random.normal(k2[0], (batch2, ch_in2), dtype=jnp.float32)
    w_in2 = jax.random.normal(k2[1], (ch_middle2, ch_in2), dtype=jnp.float32) * 0.05
    w_mid2 = jax.random.normal(k2[2], (ch_middle2,), dtype=jnp.float32)
    w_out2 = jax.random.normal(k2[3], (ch_out2, ch_middle2), dtype=jnp.float32) * 0.05

    apply_fn2 = make_fast_params_linear(w_in2, w_mid2, w_out2)
    y2 = jax.block_until_ready(apply_fn2(x2))
    y2_ref = ((x2 @ w_in2.T) * w_mid2) @ w_out2.T
    assert y2.shape == (batch2, ch_out2)
    # Tolerance covers default MXU input-rounding with a different (but
    # algebraically exact) contraction order, not kernel error.
    assert jnp.allclose(y2, y2_ref, atol=1e-2, rtol=1e-2), "low-rank path mismatch"

    print("KERNEL_OK")
</pallas_src>

<mosaic_0001>
module attributes {stable_mosaic.version = 11 : i64} {
  func.func @_folded_kernel(%arg0: i32, %arg1: memref<8x32xf32, #tpu.memory_space<vmem>>, %arg2: memref<32x128xf32, #tpu.memory_space<vmem>>, %arg3: memref<8x128xf32, #tpu.memory_space<vmem>>) attributes {dimension_semantics = [#tpu.dimension_semantics<parallel>], iteration_bounds = array<i64: 1>, scalar_prefetch = 0 : i64, scratch_operands = 0 : i64, tpu.core_type = #tpu.core_type<tc>, window_params = [{transform_indices = @transform_0, window_bounds = array<i64: 8, 32>}, {pipeline_mode = #tpu.pipeline_mode<synchronous>, transform_indices = @transform_1, window_bounds = array<i64: 32, 128>}, {transform_indices = @transform_2, window_bounds = array<i64: 8, 128>}]} {
    %c0 = arith.constant 0 : index
    %c0_0 = arith.constant 0 : index
    %0 = vector.load %arg1[%c0, %c0_0] : memref<8x32xf32, #tpu.memory_space<vmem>>, vector<8x32xf32>
    %c0_1 = arith.constant 0 : index
    %c0_2 = arith.constant 0 : index
    %1 = vector.load %arg2[%c0_1, %c0_2] : memref<32x128xf32, #tpu.memory_space<vmem>>, vector<32x128xf32>
    %cst = arith.constant dense<0.000000e+00> : vector<8x128xf32>
    %2 = tpu.matmul %0, %1, %cst {dimension_numbers = #tpu.dot_dimension_numbers<[1], [0], [0], [1], [0, 0, 1, 1], [], []>} : vector<8x32xf32>, vector<32x128xf32>, vector<8x128xf32> -> vector<8x128xf32>
    %c0_3 = arith.constant 0 : index
    %c0_4 = arith.constant 0 : index
    %3 = vector.load %arg3[%c0_3, %c0_4] : memref<8x128xf32, #tpu.memory_space<vmem>>, vector<8x128xf32>
    tpu.vector_store %arg3[%c0_3, %c0_4], %2 {strides = array<i32>} : memref<8x128xf32, #tpu.memory_space<vmem>>, vector<8x128xf32>,
    return
  }
  func.func @transform_0(%arg0: i32) -> (i32, i32) {
    %c0_i32 = arith.constant 0 : i32
    %c0_i32_0 = arith.constant 0 : i32
    return %arg0, %c0_i32 : i32, i32
  }
  func.func @transform_1(%arg0: i32) -> (i32, i32) {
    %c0_i32 = arith.constant 0 : i32
    %c0_i32_0 = arith.constant 0 : i32
    %c0_i32_1 = arith.constant 0 : i32
    return %c0_i32, %c0_i32_0 : i32, i32
  }
  func.func @transform_2(%arg0: i32) -> (i32, i32) {
    %c0_i32 = arith.constant 0 : i32
    %c0_i32_0 = arith.constant 0 : i32
    return %arg0, %c0_i32 : i32, i32
  }
}

module attributes {stable_mosaic.version = 11 : i64} {
  func.func @_folded_kernel(%arg0: i32, %arg1: memref<8x32xf32, #tpu.memory_space<vmem>>, %arg2: memref<32x128xf32, #tpu.memory_space<vmem>>, %arg3: memref<8x128xf32, #tpu.memory_space<vmem>>) attributes {dimension_semantics = [#tpu.dimension_semantics<parallel>], iteration_bounds = array<i64: 1>, scalar_prefetch = 0 : i64, scratch_operands = 0 : i64, tpu.core_type = #tpu.core_type<tc>, window_params = [{transform_indices = @transform_0, window_bounds = array<i64: 8, 32>}, {pipeline_mode = #tpu.pipeline_mode<synchronous>, transform_indices = @transform_1, window_bounds = array<i64: 32, 128>}, {transform_indices = @transform_2, window_bounds = array<i64: 8, 128>}]} {
    %c0 = arith.constant 0 : index
    %c0_0 = arith.constant 0 : index
    %0 = vector.load %arg1[%c0, %c0_0] : memref<8x32xf32, #tpu.memory_space<vmem>>, vector<8x32xf32>
    %c0_1 = arith.constant 0 : index
    %c0_2 = arith.constant 0 : index
    %1 = vector.load %arg2[%c0_1, %c0_2] : memref<32x128xf32, #tpu.memory_space<vmem>>, vector<32x128xf32>
    %cst = arith.constant dense<0.000000e+00> : vector<8x128xf32>
    %2 = tpu.matmul %0, %1, %cst {dimension_numbers = #tpu.dot_dimension_numbers<[1], [0], [0], [1], [0, 0, 1, 1], [], []>} : vector<8x32xf32>, vector<32x128xf32>, vector<8x128xf32> -> vector<8x128xf32>
    %c0_3 = arith.constant 0 : index
    %c0_4 = arith.constant 0 : index
    %3 = vector.load %arg3[%c0_3, %c0_4] : memref<8x128xf32, #tpu.memory_space<vmem>>, vector<8x128xf32>
    tpu.vector_store %arg3[%c0_3, %c0_4], %2 {strides = array<i32>} : memref<8x128xf32, #tpu.memory_space<vmem>>, vector<8x128xf32>,
    return
  }
  func.func @transform_0(%arg0: i32) -> (i32, i32) {
    %c0_i32 = arith.constant 0 : i32
    %c0_i32_0 = arith.constant 0 : i32
    return %arg0, %c0_i32 : i32, i32
  }
  func.func @transform_1(%arg0: i32) -> (i32, i32) {
    %c0_i32 = arith.constant 0 : i32
    %c0_i32_0 = arith.constant 0 : i32
    %c0_i32_1 = arith.constant 0 : i32
    return %c0_i32, %c0_i32_0 : i32, i32
  }
  func.func @transform_2(%arg0: i32) -> (i32, i32) {
    %c0_i32 = arith.constant 0 : i32
    %c0_i32_0 = arith.constant 0 : i32
    return %arg0, %c0_i32 : i32, i32
  }
}

</mosaic_0001>

<bundles_post_ra>
// kernel: tpu_custom_call.1
= control target key start
LH: loop header
LB: loop body
LE: loop exit
PB: predicated region body
PF: predicated region fallthrough
CT: control target
= control target key end

     0   :  { %7 = vsyncpa [#allocation3], 0  ;;  %s203_s0 = inlined_call_operand.hbm [shape: f32[8,32], index: 0, kind: input, shape index: {}]   ;;  %s204_s1 = inlined_call_operand.hbm [shape: f32[32,128], index: 1, kind: input, shape index: {}]   ;;  %s205_s2 = inlined_call_operand.hbm [shape: f32[8,128], index: 2, kind: output, shape index: {}]  }
   0x1   :  { %8 = vsyncpa [#allocation6], 0 }
   0x2   :  { %9 = vsyncpa [#allocation4], 0  ;;  %s15_s11 = sshll.u32 %s203_s0, 4  ;;  %s174_s12 = smov [#allocation2]   ;;  %s16_s11 = int_to_ptr.hbm [resolvable:$true] %s15_s11 }
   0x3   :  { %s17_s13 = sshll.u32 %s174_s12, 4  ;;  %s25_s16 = sshll.u32 %s204_s1, 4  ;;  %s18_s13 = int_to_ptr.vmem [resolvable:$true] %s17_s13  ;;  %s26_s16 = int_to_ptr.hbm [resolvable:$true] %s25_s16 }
   0x4   :  { %20 = dma.hbm_to_vmem [thread:$0]  %s16_s11, 128, %s18_s13, [#allocation3]  }
   0x5   :  { %s175_s17 = smov [#allocation5]   ;;  %s176_s19 = smov 128  }
   0x6   :  { %s27_s18 = sshll.u32 %s175_s17, 4  ;;  %s177_s20 = smov 8   ;;  %s28_s18 = int_to_ptr.vmem [resolvable:$true] %s27_s18 }
   0x7   :  { %33 = dma.hbm_to_vmem [thread:$0]  %s26_s16, 512, %s28_s18, [#allocation6], %s176_s19, %s176_s19, %s177_s20  }
   0x8   :  { %168 = dma.done.wait [#allocation3], 128  }
   0x9   :  { %169 = vsyncadd [#allocation3], 4294967168 }
   0xa   :  { %170 = dma.done.wait [#allocation6], 512  }
   0xb   :  { %171 = vsyncadd [#allocation6], 4294966784  ;;  %v46_v0 = vld [vmem:[#allocation5 + $0x18] sm:$0xff]  ;;  %v45_v1 = vld [vmem:[#allocation5 + $0x10] sm:$0xff]  ;;  %vm47_vm0 = vcmask 261120   ;;  %s178_s0 = smov [#allocation7]  }
   0xc   :  { %63 = vmatpush.msra.mxu0 %v46_v0  ;;  %v44_v2 = vld [vmem:[#allocation5 + $0x8] sm:$0xff]  ;;  %v43_v3 = vld [vmem:[#allocation5] sm:$0xff]  ;;  %v42_v4 = vld [vmem:[#allocation2] sm:$0xff]  ;;  %s77_s1 = sshll.u32 %s178_s0, 4  ;;  %s79_s23 = sshll.u32 %s205_s2, 4  ;;  %s78_s1 = int_to_ptr.vmem [resolvable:$true] %s77_s1  ;;  %s80_s23 = int_to_ptr.hbm [resolvable:$true] %s79_s23 }
   0xe   :  { %64 = vmatpush.msra.mxu0 %v45_v1 }
  0x10   :  { %65 = vmatpush.msra.mxu0 %v44_v2 }
  0x12   :  { %66 = vmatpush.msra.mxu0 %v43_v3 }
  0x13   :  { %90 = vmatmul.msk.f32.vlgmr.msra.gmra.mxu0 %vm47_vm0, %v42_v4 }
  0x90   :  { %v68_v5 = vpop.f32.mrf.mxu0 }
  0x91   :  { %71 = vst [vmem:[#allocation7] sm:$0xff] %v68_v5 }
  0x92   :  { %82 = dma.vmem_to_hbm [thread:$0]  %s78_s1, 128, %s80_s23, [#allocation4]  }
  0x93   :  { %172 = dma.done.wait [#allocation4], 128  }
  0x94   :  { %173 = vsyncadd [#allocation4], 4294967168 }
  0x95   :  { %87 = vsyncpa [#allocation3], 1 }
  0x96   :  { %88 = vsyncpa [#allocation6], 1 }
  0x97   :  { %89 = vsyncpa [#allocation4], 1 }

// kernel: tpu_custom_call.1
= control target key start
LH: loop header
LB: loop body
LE: loop exit
PB: predicated region body
PF: predicated region fallthrough
CT: control target
= control target key end

     0   :  { %7 = vsyncpa [#allocation3], 0  ;;  %s203_s0 = inlined_call_operand.hbm [shape: f32[8,32], index: 0, kind: input, shape index: {}]   ;;  %s204_s1 = inlined_call_operand.hbm [shape: f32[32,128], index: 1, kind: input, shape index: {}]   ;;  %s205_s2 = inlined_call_operand.hbm [shape: f32[8,128], index: 2, kind: output, shape index: {}]  }
   0x1   :  { %8 = vsyncpa [#allocation6], 0 }
   0x2   :  { %9 = vsyncpa [#allocation4], 0  ;;  %s15_s11 = sshll.u32 %s203_s0, 4  ;;  %s174_s12 = smov [#allocation2]   ;;  %s16_s11 = int_to_ptr.hbm [resolvable:$true] %s15_s11 }
   0x3   :  { %s17_s13 = sshll.u32 %s174_s12, 4  ;;  %s25_s16 = sshll.u32 %s204_s1, 4  ;;  %s18_s13 = int_to_ptr.vmem [resolvable:$true] %s17_s13  ;;  %s26_s16 = int_to_ptr.hbm [resolvable:$true] %s25_s16 }
   0x4   :  { %20 = dma.hbm_to_vmem [thread:$0]  %s16_s11, 128, %s18_s13, [#allocation3]  }
   0x5   :  { %s175_s17 = smov [#allocation5]   ;;  %s176_s19 = smov 128  }
   0x6   :  { %s27_s18 = sshll.u32 %s175_s17, 4  ;;  %s177_s20 = smov 8   ;;  %s28_s18 = int_to_ptr.vmem [resolvable:$true] %s27_s18 }
   0x7   :  { %33 = dma.hbm_to_vmem [thread:$0]  %s26_s16, 512, %s28_s18, [#allocation6], %s176_s19, %s176_s19, %s177_s20  }
   0x8   :  { %168 = dma.done.wait [#allocation3], 128  }
   0x9   :  { %169 = vsyncadd [#allocation3], 4294967168 }
   0xa   :  { %170 = dma.done.wait [#allocation6], 512  }
   0xb   :  { %171 = vsyncadd [#allocation6], 4294966784  ;;  %v46_v0 = vld [vmem:[#allocation5 + $0x18] sm:$0xff]  ;;  %v45_v1 = vld [vmem:[#allocation5 + $0x10] sm:$0xff]  ;;  %vm47_vm0 = vcmask 261120   ;;  %s178_s0 = smov [#allocation7]  }
   0xc   :  { %63 = vmatpush.msra.mxu0 %v46_v0  ;;  %v44_v2 = vld [vmem:[#allocation5 + $0x8] sm:$0xff]  ;;  %v43_v3 = vld [vmem:[#allocation5] sm:$0xff]  ;;  %v42_v4 = vld [vmem:[#allocation2] sm:$0xff]  ;;  %s77_s1 = sshll.u32 %s178_s0, 4  ;;  %s79_s23 = sshll.u32 %s205_s2, 4  ;;  %s78_s1 = int_to_ptr.vmem [resolvable:$true] %s77_s1  ;;  %s80_s23 = int_to_ptr.hbm [resolvable:$true] %s79_s23 }
   0xe   :  { %64 = vmatpush.msra.mxu0 %v45_v1 }
  0x10   :  { %65 = vmatpush.msra.mxu0 %v44_v2 }
  0x12   :  { %66 = vmatpush.msra.mxu0 %v43_v3 }
  0x13   :  { %90 = vmatmul.msk.f32.vlgmr.msra.gmra.mxu0 %vm47_vm0, %v42_v4 }
  0x90   :  { %v68_v5 = vpop.f32.mrf.mxu0 }
  0x91   :  { %71 = vst [vmem:[#allocation7] sm:$0xff] %v68_v5 }
  0x92   :  { %82 = dma.vmem_to_hbm [thread:$0]  %s78_s1, 128, %s80_s23, [#allocation4]  }
  0x93   :  { %172 = dma.done.wait [#allocation4], 128  }
  0x94   :  { %173 = vsyncadd [#allocation4], 4294967168 }
  0x95   :  { %87 = vsyncpa [#allocation3], 1 }
  0x96   :  { %88 = vsyncpa [#allocation6], 1 }
  0x97   :  { %89 = vsyncpa [#allocation4], 1 }

</bundles_post_ra>
